<compile_context>
chip_gen: v6e
topology: v6e:2x2x1
jax: 0.10.0
libtpu: 0.0.40
codegen_flags: <defaults>
</compile_context>

<pallas_src>
import jax
import jax.numpy as jnp
from jax.experimental import pallas as pl
from jax.experimental.pallas import tpu as pltpu


def _round_up(n, m):
    return ((n + m - 1) // m) * m


def simple_nn_kernel(x_ref, w1_ref, b1_ref, w2_ref, b2_ref, w3_ref, b3_ref,
                     o_ref):
    # x tile: (TB, D) f32 streamed from HBM; weights bf16 / biases f32 are
    # VMEM-resident.  Matmuls use bf16 MXU inputs with f32 accumulation;
    # bias-add / ReLU epilogues run in f32 on the VPU (free filler at this
    # arithmetic intensity).
    x = x_ref[...].astype(jnp.bfloat16)          # in-kernel cast, no wrapper copy

    # fc1 + bias + ReLU
    h1 = jnp.dot(x, w1_ref[...], preferred_element_type=jnp.float32)
    h1 = jnp.maximum(h1 + b1_ref[...], 0.0)
    # dropout(p=0.5) -> identity in eval/inference mode
    # TODO(synk): training-mode dropout (pltpu.prng_seed + prng_random_bits)
    # is not implemented; this kernel is the eval-mode forward.

    # fc2 + bias + ReLU
    h2 = jnp.dot(h1.astype(jnp.bfloat16), w2_ref[...],
                 preferred_element_type=jnp.float32)
    h2 = jnp.maximum(h2 + b2_ref[...], 0.0)
    # dropout(p=0.5) -> identity in eval/inference mode

    # fc3 logits, stored narrow (real 2 columns)
    logits = jnp.dot(h2.astype(jnp.bfloat16), w3_ref[...],
                     preferred_element_type=jnp.float32)
    o_ref[...] = (logits + b3_ref[...]).astype(o_ref.dtype)


def _choose_batch_tile(B, tb):
    """Batch tile: a multiple of 8 sublanes (or the full batch dim), and
    >= 2 grid steps when the batch is large enough so the 'parallel' axis
    can split across both TensorCores on v7x."""
    tb = max(8, (int(tb) // 8) * 8)
    if B <= tb:
        if B >= 16:
            return _round_up(pl.cdiv(B, 2), 8)   # two-ish tiles (v7x megacore)
        return B                                  # single tile == full batch dim
    return tb


def simple_nn_forward(x, w1, b1, w2, b2, w3, b3, *, tb=2048):
    """x: (B, D) f32; w1:(D,64) b1:(.,64); w2:(64,32) b2:(.,32); w3:(32,2) b3:(.,2)."""
    B, D = x.shape
    H1 = w1.shape[1]
    H2 = w2.shape[1]
    C = w3.shape[1]

    TB = _choose_batch_tile(B, tb)
    grid = (pl.cdiv(B, TB),)           # uneven edge block handled by Pallas

    # One-time tiny parameter prep (weights -> bf16 MXU inputs, biases -> f32
    # row vectors).  x itself is NOT copied/padded in the wrapper.
    w1b = w1.astype(jnp.bfloat16)
    w2b = w2.astype(jnp.bfloat16)
    w3b = w3.astype(jnp.bfloat16)
    b1f = b1.reshape(1, H1).astype(jnp.float32)
    b2f = b2.reshape(1, H2).astype(jnp.float32)
    b3f = b3.reshape(1, C).astype(jnp.float32)

    def resident(shape):
        # Same block every grid step -> stays resident in VMEM.
        return pl.BlockSpec(shape, lambda i: (0, 0))

    flops = 2 * B * (D * H1 + H1 * H2 + H2 * C)
    bytes_accessed = (B * D * 4 + B * C * 4                       # x in, logits out
                      + 2 * (D * H1 + H1 * H2 + H2 * C)           # bf16 weights
                      + 4 * (H1 + H2 + C))                        # f32 biases

    return pl.pallas_call(
        simple_nn_kernel,
        out_shape=jax.ShapeDtypeStruct((B, C), jnp.float32),      # narrow logits
        grid=grid,
        in_specs=[
            pl.BlockSpec((TB, D), lambda i: (i, 0)),   # streamed f32 x tile
            resident((D, H1)), resident((1, H1)),
            resident((H1, H2)), resident((1, H2)),
            resident((H2, C)), resident((1, C)),
        ],
        out_specs=pl.BlockSpec((TB, C), lambda i: (i, 0)),
        compiler_params=pltpu.CompilerParams(
            dimension_semantics=("parallel",)),        # shard batch across TCs (v7x)
        cost_estimate=pl.CostEstimate(
            flops=flops, transcendentals=0, bytes_accessed=bytes_accessed),
    )(x, w1b, b1f, w2b, b2f, w3b, b3f)


def init_linear(key, fan_in, fan_out):
    # Mimic PyTorch nn.Linear default init: U(-1/sqrt(fan_in), 1/sqrt(fan_in))
    kw, kb = jax.random.split(key)
    bound = 1.0 / jnp.sqrt(fan_in)
    w = jax.random.uniform(kw, (fan_in, fan_out), jnp.float32, -bound, bound)
    b = jax.random.uniform(kb, (1, fan_out), jnp.float32, -bound, bound)
    return w, b


if __name__ == "__main__":
    key = jax.random.PRNGKey(0)
    k_x, k1, k2, k3 = jax.random.split(key, 4)

    B = 24            # small test batch; tb=8 -> 3-step grid exercising pipeline
    INPUT_DIM = 100   # word2vec vector_size=100 -> input_dim

    x = jax.random.normal(k_x, (B, INPUT_DIM), jnp.float32)
    w1, b1 = init_linear(k1, INPUT_DIM, 64)
    w2, b2 = init_linear(k2, 64, 32)
    w3, b3 = init_linear(k3, 32, 2)

    out = simple_nn_forward(x, w1, b1, w2, b2, w3, b3, tb=8)
    out = jax.block_until_ready(out)
    assert out.shape == (B, 2)

    # Mixed-precision JAX reference matching the kernel's numerics
    # (bf16 MXU inputs, f32 accumulation, f32 epilogue).
    xb = x.astype(jnp.bfloat16)
    h1 = jnp.maximum(
        jnp.dot(xb, w1.astype(jnp.bfloat16),
                preferred_element_type=jnp.float32) + b1, 0.0)
    h2 = jnp.maximum(
        jnp.dot(h1.astype(jnp.bfloat16), w2.astype(jnp.bfloat16),
                preferred_element_type=jnp.float32) + b2, 0.0)
    ref = jnp.dot(h2.astype(jnp.bfloat16), w3.astype(jnp.bfloat16),
                  preferred_element_type=jnp.float32) + b3
    assert jnp.allclose(out, ref, atol=2e-3, rtol=2e-3)

    # Sanity check vs. full-f32 math (looser tolerance for bf16 MXU inputs).
    h1f = jnp.maximum(x @ w1 + b1, 0.0)
    h2f = jnp.maximum(h1f @ w2 + b2, 0.0)
    reff = h2f @ w3 + b3
    assert jnp.allclose(out, reff, atol=5e-2, rtol=5e-2)

    print("KERNEL_OK")
</pallas_src>

<mosaic_0001>
module attributes {stable_mosaic.version = 11 : i64} {
  func.func @simple_nn_kernel(%arg0: i32, %arg1: memref<8x100xf32, #tpu.memory_space<vmem>>, %arg2: memref<100x64xbf16, #tpu.memory_space<vmem>>, %arg3: memref<1x64xf32, #tpu.memory_space<vmem>>, %arg4: memref<64x32xbf16, #tpu.memory_space<vmem>>, %arg5: memref<1x32xf32, #tpu.memory_space<vmem>>, %arg6: memref<32x2xbf16, #tpu.memory_space<vmem>>, %arg7: memref<1x2xf32, #tpu.memory_space<vmem>>, %arg8: memref<8x2xf32, #tpu.memory_space<vmem>>) attributes {dimension_semantics = [#tpu.dimension_semantics<parallel>], iteration_bounds = array<i64: 3>, scalar_prefetch = 0 : i64, scratch_operands = 0 : i64, tpu.core_type = #tpu.core_type<tc>, window_params = [{transform_indices = @transform_0, window_bounds = array<i64: 8, 100>}, {pipeline_mode = #tpu.pipeline_mode<synchronous>, transform_indices = @transform_1, window_bounds = array<i64: 100, 64>}, {pipeline_mode = #tpu.pipeline_mode<synchronous>, transform_indices = @transform_2, window_bounds = array<i64: 1, 64>}, {pipeline_mode = #tpu.pipeline_mode<synchronous>, transform_indices = @transform_3, window_bounds = array<i64: 64, 32>}, {pipeline_mode = #tpu.pipeline_mode<synchronous>, transform_indices = @transform_4, window_bounds = array<i64: 1, 32>}, {pipeline_mode = #tpu.pipeline_mode<synchronous>, transform_indices = @transform_5, window_bounds = array<i64: 32, 2>}, {pipeline_mode = #tpu.pipeline_mode<synchronous>, transform_indices = @transform_6, window_bounds = array<i64: 1, 2>}, {transform_indices = @transform_7, window_bounds = array<i64: 8, 2>}]} {
    %c0 = arith.constant 0 : index
    %c0_0 = arith.constant 0 : index
    %0 = vector.load %arg1[%c0, %c0_0] : memref<8x100xf32, #tpu.memory_space<vmem>>, vector<8x100xf32>
    %1 = arith.truncf %0 : vector<8x100xf32> to vector<8x100xbf16>
    %c0_1 = arith.constant 0 : index
    %c0_2 = arith.constant 0 : index
    %2 = vector.load %arg2[%c0_1, %c0_2] : memref<100x64xbf16, #tpu.memory_space<vmem>>, vector<100x64xbf16>
    %cst = arith.constant dense<0.000000e+00> : vector<8x64xf32>
    %3 = tpu.matmul %1, %2, %cst {dimension_numbers = #tpu.dot_dimension_numbers<[1], [0], [0], [1], [0, 0, 1, 1], [], []>} : vector<8x100xbf16>, vector<100x64xbf16>, vector<8x64xf32> -> vector<8x64xf32>
    %c0_3 = arith.constant 0 : index
    %c0_4 = arith.constant 0 : index
    %4 = vector.load %arg3[%c0_3, %c0_4] : memref<1x64xf32, #tpu.memory_space<vmem>>, vector<1x64xf32>
    %5 = vector.broadcast %4 : vector<1x64xf32> to vector<8x64xf32>
    %6 = arith.addf %3, %5 : vector<8x64xf32>
    %cst_5 = arith.constant 0.000000e+00 : f32
    %7 = vector.broadcast %cst_5 : f32 to vector<8x64xf32>
    %8 = arith.maximumf %6, %7 : vector<8x64xf32>
    %9 = arith.truncf %8 : vector<8x64xf32> to vector<8x64xbf16>
    %c0_6 = arith.constant 0 : index
    %c0_7 = arith.constant 0 : index
    %10 = vector.load %arg4[%c0_6, %c0_7] : memref<64x32xbf16, #tpu.memory_space<vmem>>, vector<64x32xbf16>
    %cst_8 = arith.constant dense<0.000000e+00> : vector<8x32xf32>
    %11 = tpu.matmul %9, %10, %cst_8 {dimension_numbers = #tpu.dot_dimension_numbers<[1], [0], [0], [1], [0, 0, 1, 1], [], []>} : vector<8x64xbf16>, vector<64x32xbf16>, vector<8x32xf32> -> vector<8x32xf32>
    %c0_9 = arith.constant 0 : index
    %c0_10 = arith.constant 0 : index
    %12 = vector.load %arg5[%c0_9, %c0_10] : memref<1x32xf32, #tpu.memory_space<vmem>>, vector<1x32xf32>
    %13 = vector.broadcast %12 : vector<1x32xf32> to vector<8x32xf32>
    %14 = arith.addf %11, %13 : vector<8x32xf32>
    %cst_11 = arith.constant 0.000000e+00 : f32
    %15 = vector.broadcast %cst_11 : f32 to vector<8x32xf32>
    %16 = arith.maximumf %14, %15 : vector<8x32xf32>
    %17 = arith.truncf %16 : vector<8x32xf32> to vector<8x32xbf16>
    %c0_12 = arith.constant 0 : index
    %c0_13 = arith.constant 0 : index
    %18 = vector.load %arg6[%c0_12, %c0_13] : memref<32x2xbf16, #tpu.memory_space<vmem>>, vector<32x2xbf16>
    %cst_14 = arith.constant dense<0.000000e+00> : vector<8x2xf32>
    %19 = tpu.matmul %17, %18, %cst_14 {dimension_numbers = #tpu.dot_dimension_numbers<[1], [0], [0], [1], [0, 0, 1, 1], [], []>} : vector<8x32xbf16>, vector<32x2xbf16>, vector<8x2xf32> -> vector<8x2xf32>
    %c0_15 = arith.constant 0 : index
    %c0_16 = arith.constant 0 : index
    %20 = vector.load %arg7[%c0_15, %c0_16] : memref<1x2xf32, #tpu.memory_space<vmem>>, vector<1x2xf32>
    %21 = vector.broadcast %20 : vector<1x2xf32> to vector<8x2xf32>
    %22 = arith.addf %19, %21 : vector<8x2xf32>
    %c0_17 = arith.constant 0 : index
    %c0_18 = arith.constant 0 : index
    %23 = vector.load %arg8[%c0_17, %c0_18] : memref<8x2xf32, #tpu.memory_space<vmem>>, vector<8x2xf32>
    tpu.vector_store %arg8[%c0_17, %c0_18], %22 {strides = array<i32>} : memref<8x2xf32, #tpu.memory_space<vmem>>, vector<8x2xf32>,
    return
  }
  func.func @transform_0(%arg0: i32) -> (i32, i32) {
    %c0_i32 = arith.constant 0 : i32
    %c0_i32_0 = arith.constant 0 : i32
    return %arg0, %c0_i32 : i32, i32
  }
  func.func @transform_1(%arg0: i32) -> (i32, i32) {
    %c0_i32 = arith.constant 0 : i32
    %c0_i32_0 = arith.constant 0 : i32
    %c0_i32_1 = arith.constant 0 : i32
    return %c0_i32, %c0_i32_0 : i32, i32
  }
  func.func @transform_2(%arg0: i32) -> (i32, i32) {
    %c0_i32 = arith.constant 0 : i32
    %c0_i32_0 = arith.constant 0 : i32
    %c0_i32_1 = arith.constant 0 : i32
    return %c0_i32, %c0_i32_0 : i32, i32
  }
  func.func @transform_3(%arg0: i32) -> (i32, i32) {
    %c0_i32 = arith.constant 0 : i32
    %c0_i32_0 = arith.constant 0 : i32
    %c0_i32_1 = arith.constant 0 : i32
    return %c0_i32, %c0_i32_0 : i32, i32
  }
  func.func @transform_4(%arg0: i32) -> (i32, i32) {
    %c0_i32 = arith.constant 0 : i32
    %c0_i32_0 = arith.constant 0 : i32
    %c0_i32_1 = arith.constant 0 : i32
    return %c0_i32, %c0_i32_0 : i32, i32
  }
  func.func @transform_5(%arg0: i32) -> (i32, i32) {
    %c0_i32 = arith.constant 0 : i32
    %c0_i32_0 = arith.constant 0 : i32
    %c0_i32_1 = arith.constant 0 : i32
    return %c0_i32, %c0_i32_0 : i32, i32
  }
  func.func @transform_6(%arg0: i32) -> (i32, i32) {
    %c0_i32 = arith.constant 0 : i32
    %c0_i32_0 = arith.constant 0 : i32
    %c0_i32_1 = arith.constant 0 : i32
    return %c0_i32, %c0_i32_0 : i32, i32
  }
  func.func @transform_7(%arg0: i32) -> (i32, i32) {
    %c0_i32 = arith.constant 0 : i32
    %c0_i32_0 = arith.constant 0 : i32
    return %arg0, %c0_i32 : i32, i32
  }
}

</mosaic_0001>

<bundles_post_ra>
// kernel: tpu_custom_call.1
= control target key start
LH: loop header
LB: loop body
LE: loop exit
PB: predicated region body
PF: predicated region fallthrough
CT: control target
= control target key end

     0   :  { %s748_s24 = smov 0   ;;  %s823_s0 = inlined_call_operand.vmem [shape: f32[24,100], index: 0, kind: input, shape index: {}]   ;;  %s824_s1 = inlined_call_operand.vmem [shape: bf16[100,64], index: 1, kind: input, shape index: {}]   ;;  %s825_s2 = inlined_call_operand.vmem [shape: f32[1,64], index: 2, kind: input, shape index: {}]   ;;  %s826_s3 = inlined_call_operand.vmem [shape: bf16[64,32], index: 3, kind: input, shape index: {}]   ;;  %s827_s4 = inlined_call_operand.vmem [shape: f32[1,32], index: 4, kind: input, shape index: {}]   ;;  %s828_s5 = inlined_call_operand.vmem [shape: bf16[32,2], index: 5, kind: input, shape index: {}]   ;;  %s829_s6 = inlined_call_operand.vmem [shape: f32[1,2], index: 6, kind: input, shape index: {}]   ;;  %s830_s7 = inlined_call_operand.vmem [shape: f32[24,2], index: 7, kind: output, shape index: {}]  }
   0x1 LB: > { %s593_s25 = sadd.s32 4294967295, %s704_s24   ;;  %p597_p0 = scmp.ge.s32.totalorder %s704_s24, 1  ;;  %s704_s24 = sphi %s748_s24, %s17_s24  }
   0x2   : > { %p236_p1 = scmp.lt.s32.totalorder %s704_s24, 4 }
   0x4   : > { %p237_p2 = pnand %p597_p0, %p236_p1 }
   0x5   : > { %p266_p3 = scmp.lt.s32.totalorder (!%p237_p2), %s593_s25, 2 }
   0x6   : > { %240 = sbr.rel (%p237_p2) target bundleno = 637 (0x27d), region = 48 }
   0xb   : > { %v685_v0 = vld [vmem:[%s824_s1 + $0x30] ss:$0 sps:$4 sm:$0x33]   ;;  %v706_v1 = vmov 0.0   ;;  %vm340_vm0 = vcmask 1041408   ;;  %v686_v3 = vld [vmem:[%s824_s1 + $0x28] sm:$0xff]  }
   0xc   : > { %637 = vmatprep.subr.bf16.mxu0 %v706_v1  ;;  %655 = vmatprep.subr.bf16.mxu1 %v706_v1  ;;  %v342_v2 = vsel %vm340_vm0, %v685_v0, 0  ;;  %vm707_vm1 = vmmov 0   ;;  %v687_v4 = vld [vmem:[%s824_s1 + $0x20] sm:$0xff]   ;;  %v692_v5 = vld [vmem:[%s826_s3 + $0x18] sm:$0xff]   ;;  %v693_v6 = vld [vmem:[%s826_s3 + $0x10] sm:$0xff]   ;;  %s832_s25 = smov (!%p266_p3, %s593_s25), 2 }
   0xd   : > { %638 = vmatpush3.bf16.msra.mxu0 %v342_v2  ;;  %651 = vmatprep.mubr.msk.bf16.mxu0 %vm707_vm1, %v706_v1  ;;  %v688_v7 = vld [vmem:[%s824_s1 + $0x18] sm:$0xff]   ;;  %v689_v8 = vld [vmem:[%s824_s1 + $0x10] sm:$0xff]   ;;  %s598_s17 = sshll.u32 %s832_s25, 3  ;;  %v690_v9 = vld [vmem:[%s824_s1 + $0x8] sm:$0xff]   ;;  %vm336_vm2 = vcmask 818176   ;;  %vm425_vm3 = vcmask 523264  }
   0xe   : > { %639 = vmatprep.subr.bf16.mxu0 %v706_v1  ;;  %663 = vmatprep.mubr.msk.bf16.mxu1 %vm707_vm1, %v706_v1  ;;  %s269_s22 = scalar_lea.vmem %s823_s0, %s598_s17  ;;  %v691_v10 = vld [vmem:[%s824_s1] sm:$0xff]   ;;  %v694_v13 = vld [vmem:[%s826_s3 + $0x8] sm:$0xff]   ;;  %vm494_vm4 = vcmask 261120   ;;  %s273_s21 = scalar_lea.vmem %s830_s7, %s598_s17  ;;  %vm538_vm5 = vcmask 15360  }
   0xf   : > { %656 = vmatpush3.bf16.msra.mxu1 %v692_v5  ;;  %v275_v11 = vld [vmem:[%s269_s22] sm:$0xff]  ;;  %v696_v21 = vld [vmem:[%s828_s5 + $0x8] sm:$0xff]  }
  0x10   : > { %657 = vmatprep.subr.bf16.mxu1 %v706_v1  ;;  %v276_v12 = vpack.c.bf16 %v275_v11, %v275_v11  ;;  %v695_v14 = vld [vmem:[%s826_s3] sm:$0xff]  }
  0x11   : > { %640 = vmatpush3.bf16.msra.mxu0 %v686_v3  ;;  %v600_v15 = vld [vmem:[%s825_s2] ss:$0 sm:$0xff] }
  0x12   : > { %641 = vmatprep.subr.bf16.mxu0 %v706_v1  ;;  %v697_v24 = vld [vmem:[%s828_s5] sm:$0xff]  }
  0x13   : > { %658 = vmatpush3.bf16.msra.mxu1 %v693_v6  ;;  %v609_v25 = vld [vmem:[%s827_s4] ss:$0 sm:$0xff] }
  0x14   : > { %659 = vmatprep.subr.bf16.mxu1 %v706_v1  ;;  %v615_v33 = vld [vmem:[%s829_s6] ss:$0 sm:$0xff] }
  0x15   : > { %642 = vmatpush3.bf16.msra.mxu0 %v687_v4 }
  0x16   : > { %643 = vmatprep.subr.bf16.mxu0 %v706_v1 }
  0x17   : > { %660 = vmatpush3.bf16.msra.mxu1 %v694_v13 }
  0x18   : > { %661 = vmatprep.subr.bf16.mxu1 %v706_v1 }
  0x19   : > { %644 = vmatpush3.bf16.msra.mxu0 %v688_v7 }
  0x1a   : > { %645 = vmatprep.subr.bf16.mxu0 %v706_v1 }
  0x1b   : > { %662 = vmatpush3.bf16.msra.mxu1 %v695_v14 }
  0x1c   : > { %667 = vmatprep.subr.bf16.mxu1 %v706_v1 }
  0x1d   : > { %646 = vmatpush3.bf16.msra.mxu0 %v689_v8 }
  0x1e   : > { %647 = vmatprep.subr.bf16.mxu0 %v706_v1 }
  0x21   : > { %648 = vmatpush3.bf16.msra.mxu0 %v690_v9 }
  0x22   : > { %649 = vmatprep.subr.bf16.mxu0 %v706_v1 }
  0x25   : > { %650 = vmatpush3.bf16.msra.mxu0 %v691_v10 }
  0x28   : > { %652 = vmatmul.mubr.msk.bf16.vlgmr.msra.gmra.mxu0 %vm336_vm2, %v276_v12 }
  0xe8   : > { %v378_v16 = vpop.f32.mrf.mxu0 }
  0xe9   : > { %v379_v17 = vadd.f32 %v600_v15, %v378_v16 }
  0xea   : > { %v653_v18 = vpop.f32.mrf.mxu0 }
  0xeb   : > { %v384_v19 = vmax.f32 %v379_v17, 0.0 }
  0xec   : > { %v381_v20 = vpop.f32.mrf.mxu0 }
  0xed   : > { %v385_v22 = vpack.c.bf16 %v384_v19, %v384_v19 }
  0xee   : > { %v654_v23 = vpop.f32.mrf.mxu0 }
  0xef   : > { %664 = vmatmul.mubr.msk.bf16.vlgmr.msra.gmra.mxu1 %vm425_vm3, %v385_v22 }
  0xf0   : > { %668 = vmatpush3.bf16.msra.mxu1 %v696_v21  ;;  %671 = vmatprep.mubr.msk.bf16.mxu1 %vm707_vm1, %v706_v1 }
  0xf1   : > { %669 = vmatprep.subr.bf16.mxu1 %v706_v1 }
  0xf4   : > { %670 = vmatpush3.bf16.msra.mxu1 %v697_v24 }
 0x1af   : > { %v463_v26 = vpop.f32.mrf.mxu1 }
 0x1b0   : > { %v464_v27 = vadd.f32 %v609_v25, %v463_v26 }
 0x1b1   : > { %v665_v28 = vpop.f32.mrf.mxu1 }
 0x1b2   : > { %v469_v29 = vmax.f32 %v464_v27, 0.0 }
 0x1b3   : > { %v466_v30 = vpop.f32.mrf.mxu1 }
 0x1b4   : > { %v470_v31 = vpack.c.bf16 %v469_v29, %v469_v29 }
 0x1b5   : > { %v666_v32 = vpop.f32.mrf.mxu1 }
 0x1b6   : > { %672 = vmatmul.mubr.msk.bf16.vlgmr.msra.gmra.mxu1 %vm494_vm4, %v470_v31 }
 0x276   : > { %v532_v34 = vpop.f32.mrf.mxu1 }
 0x277   : > { %v533_v35 = vadd.f32 %v615_v33, %v532_v34 }
 0x278   : > { %v673_v36 = vpop.f32.mrf.mxu1 }
 0x279   : > { %539 = vst.msk [vmem:[%s273_s21] sm:$0xff] %vm538_vm5, %v533_v35 }
 0x27a   : > { %v535_v37 = vpop.f32.mrf.mxu1 }
 0x27c   : > { %v674_v38 = vpop.f32.mrf.mxu1 }
 0x27d PF: > { %s17_s24 = sadd.s32 1, %s704_s24  }
 0x27e   : > { %p14_p4 = scmp.ge.s32.totalorder %s17_s24, 5  }
 0x280   :  { %16 = sbr.rel (!%p14_p4) target bundleno = 1 (0x1), region = 78 }

</bundles_post_ra>
